<compile_context>
chip_gen: v6e
topology: v6e:2x2x1
jax: 0.10.0
libtpu: 0.0.40
codegen_flags: <defaults>
</compile_context>

<pallas_src>
import functools

import jax
import jax.numpy as jnp
import numpy as np
from jax.experimental import pallas as pl
from jax.experimental.pallas import tpu as pltpu


def _round_up(n, m):
    return ((n + m - 1) // m) * m


# ----------------------------------------------------------------------------
# Kernel: the whole T-step decode in one invocation (no grid).
# ----------------------------------------------------------------------------
def _decoder_kernel(x_ref,        # VMEM (Tp, E)    gathered embedding rows (rows >= T zero)
                    wih_t_ref,    # VMEM (E, 3*Hp)  W_ih^T, per-gate zero-padded to Hp
                    whh_t_ref,    # VMEM (Hp, 3*Hp) W_hh^T, padded
                    b_gates_ref,  # VMEM (2, 3*Hp)  row0 = b_ih, row1 = b_hh (padded)
                    wd_t_ref,     # VMEM (Hp, Vp)   dense weight^T, padded
                    bd_ref,       # VMEM (1, Vp)    dense bias, padded
                    h0_ref,       # VMEM (1, Hp)    initial hidden (padded)
                    out_ref,      # VMEM (Tp, Vp)   log-softmax per step
                    hout_ref,     # VMEM (1, Hp)    hidden after the last step
                    gi_s,         # VMEM (Tp, 3*Hp) scratch: hoisted input projection
                    hall_s,       # VMEM (Tp, Hp)   scratch: all per-step hidden states
                    *, seq_len, vocab_size):
    Hp = h0_ref.shape[1]
    Vp = out_ref.shape[1]

    # ---- Input projection for ALL steps at once: one well-shaped MXU pass,
    # hoisted out of the serial recurrence (teacher forcing).
    gi_s[...] = (jnp.dot(x_ref[...], wih_t_ref[...],
                         preferred_element_type=jnp.float32)
                 + b_gates_ref[0:1, :])
    hall_s[...] = jnp.zeros_like(hall_s)      # deterministic padded rows

    whh_t = whh_t_ref[...]                    # hoisted loads (loop-invariant)
    b_hh = b_gates_ref[1:2, :]

    # ---- Serial GRU recurrence: one small matmul + VPU gates per step.
    # Gate order r, z, n matches torch.nn.GRU.  128-aligned gate slices.
    def step(t, h):
        gi = gi_s[pl.ds(t, 1), :]                                        # (1, 3Hp)
        gh = jnp.dot(h, whh_t, preferred_element_type=jnp.float32) + b_hh
        i_r, i_z, i_n = gi[:, 0:Hp], gi[:, Hp:2 * Hp], gi[:, 2 * Hp:3 * Hp]
        h_r, h_z, h_n = gh[:, 0:Hp], gh[:, Hp:2 * Hp], gh[:, 2 * Hp:3 * Hp]
        r = jax.nn.sigmoid(i_r + h_r)
        z = jax.nn.sigmoid(i_z + h_z)
        n = jnp.tanh(i_n + r * h_n)
        h_new = (1.0 - z) * n + z * h          # padded lanes stay exactly 0
        hall_s[pl.ds(t, 1), :] = h_new
        return h_new

    h_last = jax.lax.fori_loop(0, seq_len, step, h0_ref[...], unroll=True)
    hout_ref[...] = h_last

    # ---- Dense head + log-softmax for ALL steps at once (lane-dense store).
    logits = (jnp.dot(hall_s[...], wd_t_ref[...],
                      preferred_element_type=jnp.float32) + bd_ref[...])  # (Tp, Vp)
    if vocab_size < Vp:   # mask vocab padding only when V is not a 128-multiple
        lane = jax.lax.broadcasted_iota(jnp.int32, (1, Vp), 1)
        logits = jnp.where(lane < vocab_size, logits, -1e30)
    m = jnp.max(logits, axis=1, keepdims=True)
    shifted = logits - m
    lse = jnp.log(jnp.sum(jnp.exp(shifted), axis=1, keepdims=True))
    out_ref[...] = shifted - lse


# ----------------------------------------------------------------------------
# Glue: pad / transpose weights into lane-friendly, 128-aligned layouts.
# ----------------------------------------------------------------------------
def _prep_decoder_params(params, Hp, Vp):
    f32 = jnp.float32
    V, E = params["embed"].shape
    H = params["w_hh"].shape[1]

    def pad_gates_out(w_t):          # (fan_in, 3H) -> (fan_in, 3*Hp)
        fan_in = w_t.shape[0]
        w = w_t.reshape(fan_in, 3, H)
        w = jnp.pad(w, ((0, 0), (0, 0), (0, Hp - H)))
        return w.reshape(fan_in, 3 * Hp)

    wih_t = pad_gates_out(params["w_ih"].T.astype(f32))              # (E, 3Hp)
    whh_t = pad_gates_out(params["w_hh"].T.astype(f32))              # (H, 3Hp)
    whh_t = jnp.pad(whh_t, ((0, Hp - H), (0, 0)))                    # (Hp, 3Hp)

    def pad_gate_bias(b):            # (3H,) -> (3Hp,)
        return jnp.pad(b.astype(f32).reshape(3, H),
                       ((0, 0), (0, Hp - H))).reshape(3 * Hp)

    b_gates = jnp.stack([pad_gate_bias(params["b_ih"]),
                         pad_gate_bias(params["b_hh"])], axis=0)     # (2, 3Hp)

    wd_t = jnp.pad(params["w_dense"].T.astype(f32),
                   ((0, Hp - H), (0, Vp - V)))                       # (Hp, Vp)
    bd = jnp.pad(params["b_dense"].astype(f32), (0, Vp - V)).reshape(1, Vp)

    return wih_t, whh_t, b_gates, wd_t, bd


# ----------------------------------------------------------------------------
# Fused multi-step decode: T steps in ONE pallas_call (teacher forcing).
# ----------------------------------------------------------------------------
def decoder_decode_sequence(tokens, hidden, params):
    V, E = params["embed"].shape
    H = params["w_hh"].shape[1]
    Hp = _round_up(H, 128)
    Vp = _round_up(V, 128)
    G = 3 * Hp

    toks = jnp.asarray(tokens, jnp.int32).reshape(-1)
    T = int(toks.shape[0])
    Tp = _round_up(max(T, 1), 8)     # sublane-friendly row count

    wih_t, whh_t, b_gates, wd_t, bd = _prep_decoder_params(params, Hp, Vp)

    # Embedding gather done once outside the kernel: one contiguous slab.
    x = jnp.take(params["embed"].astype(jnp.float32), toks, axis=0)  # (T, E)
    x = jnp.pad(x, ((0, Tp - T), (0, 0)))                            # (Tp, E)

    h0 = jnp.pad(hidden.astype(jnp.float32).reshape(1, H),
                 ((0, 0), (0, Hp - H)))                              # (1, Hp)

    log_probs_p, h_last_p = pl.pallas_call(
        functools.partial(_decoder_kernel, seq_len=T, vocab_size=V),
        out_shape=(jax.ShapeDtypeStruct((Tp, Vp), jnp.float32),
                   jax.ShapeDtypeStruct((1, Hp), jnp.float32)),
        scratch_shapes=[pltpu.VMEM((Tp, G), jnp.float32),
                        pltpu.VMEM((Tp, Hp), jnp.float32)],
    )(x, wih_t, whh_t, b_gates, wd_t, bd, h0)

    log_probs = log_probs_p[:T, :V]                     # (T, V)
    h_last = h_last_p[:, :H].reshape(hidden.shape)
    return log_probs, h_last


# ----------------------------------------------------------------------------
# Single-step wrapper with the exact PyTorch module semantics.
# ----------------------------------------------------------------------------
def decoder_forward(token, hidden, params):
    """Mirrors Decoder.forward(input, hidden) -> (log_softmax_out, hidden)."""
    tok = jnp.asarray(token, jnp.int32).reshape((1,))
    log_probs, _h_new = decoder_decode_sequence(tok, hidden, params)
    # The PyTorch module returns the ORIGINAL hidden, not the new GRU state.
    return log_probs, hidden


# ----------------------------------------------------------------------------
# Pure-JAX references for correctness checks.
# ----------------------------------------------------------------------------
def _gru_cell_ref(x, h, params):
    H = h.shape[-1]
    gi = x @ params["w_ih"].T + params["b_ih"]
    gh = h @ params["w_hh"].T + params["b_hh"]
    i_r, i_z, i_n = gi[:, :H], gi[:, H:2 * H], gi[:, 2 * H:]
    h_r, h_z, h_n = gh[:, :H], gh[:, H:2 * H], gh[:, 2 * H:]
    r = jax.nn.sigmoid(i_r + h_r)
    z = jax.nn.sigmoid(i_z + h_z)
    n = jnp.tanh(i_n + r * h_n)
    return (1.0 - z) * n + z * h


def _reference_forward(token, hidden, params):
    H = hidden.shape[-1]
    x = params["embed"][token].reshape(1, -1)
    h = hidden.reshape(1, H)
    h_new = _gru_cell_ref(x, h, params)
    logits = h_new @ params["w_dense"].T + params["b_dense"]
    return jax.nn.log_softmax(logits, axis=1), hidden


def _reference_sequence(tokens, hidden, params):
    H = hidden.shape[-1]
    h = hidden.reshape(1, H)
    outs = []
    for t in np.asarray(tokens):
        x = params["embed"][int(t)].reshape(1, -1)
        h = _gru_cell_ref(x, h, params)
        logits = h @ params["w_dense"].T + params["b_dense"]
        outs.append(jax.nn.log_softmax(logits, axis=1))
    return jnp.concatenate(outs, axis=0), h.reshape(hidden.shape)


if __name__ == "__main__":
    vocab_size, hidden_size, embed_dim = 64, 32, 16
    seq_len = 8

    key = jax.random.PRNGKey(0)
    ks = jax.random.split(key, 9)
    scale = 0.1
    params = {
        "embed":   scale * jax.random.normal(ks[0], (vocab_size, embed_dim), jnp.float32),
        "w_ih":    scale * jax.random.normal(ks[1], (3 * hidden_size, embed_dim), jnp.float32),
        "w_hh":    scale * jax.random.normal(ks[2], (3 * hidden_size, hidden_size), jnp.float32),
        "b_ih":    scale * jax.random.normal(ks[3], (3 * hidden_size,), jnp.float32),
        "b_hh":    scale * jax.random.normal(ks[4], (3 * hidden_size,), jnp.float32),
        "w_dense": scale * jax.random.normal(ks[5], (vocab_size, hidden_size), jnp.float32),
        "b_dense": scale * jax.random.normal(ks[6], (vocab_size,), jnp.float32),
    }

    token = jnp.array(7, dtype=jnp.int32)
    hidden = scale * jax.random.normal(ks[7], (1, 1, hidden_size), jnp.float32)

    # --- single step: exact module semantics ---
    log_probs, hidden_out = decoder_forward(token, hidden, params)
    jax.block_until_ready(log_probs)
    ref_lp, ref_h = _reference_forward(int(token), hidden, params)
    np.testing.assert_allclose(np.asarray(log_probs), np.asarray(ref_lp),
                               rtol=1e-4, atol=1e-5)
    np.testing.assert_allclose(np.asarray(hidden_out), np.asarray(ref_h))

    # --- fused multi-step decode: one kernel invocation for all T steps ---
    tokens = jax.random.randint(ks[8], (seq_len,), 0, vocab_size, jnp.int32)
    seq_lp, seq_h = decoder_decode_sequence(tokens, hidden, params)
    jax.block_until_ready(seq_lp)
    ref_seq_lp, ref_seq_h = _reference_sequence(tokens, hidden, params)
    np.testing.assert_allclose(np.asarray(seq_lp), np.asarray(ref_seq_lp),
                               rtol=1e-4, atol=1e-5)
    np.testing.assert_allclose(np.asarray(seq_h), np.asarray(ref_seq_h),
                               rtol=1e-4, atol=1e-5)

    print("KERNEL_OK")
</pallas_src>

<mosaic_0001>
module attributes {stable_mosaic.version = 11 : i64} {
  func.func @_decoder_kernel(%arg0: memref<8x16xf32, #tpu.memory_space<vmem>>, %arg1: memref<16x384xf32, #tpu.memory_space<vmem>>, %arg2: memref<128x384xf32, #tpu.memory_space<vmem>>, %arg3: memref<2x384xf32, #tpu.memory_space<vmem>>, %arg4: memref<128x128xf32, #tpu.memory_space<vmem>>, %arg5: memref<1x128xf32, #tpu.memory_space<vmem>>, %arg6: memref<1x128xf32, #tpu.memory_space<vmem>>, %arg7: memref<8x128xf32, #tpu.memory_space<vmem>>, %arg8: memref<1x128xf32, #tpu.memory_space<vmem>>, %arg9: memref<8x384xf32, #tpu.memory_space<vmem>>, %arg10: memref<8x128xf32, #tpu.memory_space<vmem>>) attributes {dimension_semantics = [], scalar_prefetch = 0 : i64, scratch_operands = 2 : i64, tpu.core_type = #tpu.core_type<tc>} {
    %c0 = arith.constant 0 : index
    %c0_0 = arith.constant 0 : index
    %0 = vector.load %arg0[%c0, %c0_0] : memref<8x16xf32, #tpu.memory_space<vmem>>, vector<8x16xf32>
    %c0_1 = arith.constant 0 : index
    %c0_2 = arith.constant 0 : index
    %1 = vector.load %arg1[%c0_1, %c0_2] : memref<16x384xf32, #tpu.memory_space<vmem>>, vector<16x384xf32>
    %cst = arith.constant dense<0.000000e+00> : vector<8x384xf32>
    %2 = tpu.matmul %0, %1, %cst {dimension_numbers = #tpu.dot_dimension_numbers<[1], [0], [0], [1], [0, 0, 1, 1], [], []>} : vector<8x16xf32>, vector<16x384xf32>, vector<8x384xf32> -> vector<8x384xf32>
    %c0_3 = arith.constant 0 : index
    %c0_4 = arith.constant 0 : index
    %3 = vector.load %arg3[%c0_3, %c0_4] : memref<2x384xf32, #tpu.memory_space<vmem>>, vector<1x384xf32>
    %4 = vector.broadcast %3 : vector<1x384xf32> to vector<8x384xf32>
    %5 = arith.addf %2, %4 : vector<8x384xf32>
    %c0_5 = arith.constant 0 : index
    %c0_6 = arith.constant 0 : index
    %6 = vector.load %arg9[%c0_5, %c0_6] : memref<8x384xf32, #tpu.memory_space<vmem>>, vector<8x384xf32>
    tpu.vector_store %arg9[%c0_5, %c0_6], %5 {strides = array<i32>} : memref<8x384xf32, #tpu.memory_space<vmem>>, vector<8x384xf32>,
    %cst_7 = arith.constant 0.000000e+00 : f32
    %7 = vector.broadcast %cst_7 : f32 to vector<8x128xf32>
    %c0_8 = arith.constant 0 : index
    %c0_9 = arith.constant 0 : index
    %8 = vector.load %arg10[%c0_8, %c0_9] : memref<8x128xf32, #tpu.memory_space<vmem>>, vector<8x128xf32>
    tpu.vector_store %arg10[%c0_8, %c0_9], %7 {strides = array<i32>} : memref<8x128xf32, #tpu.memory_space<vmem>>, vector<8x128xf32>,
    %c0_10 = arith.constant 0 : index
    %c0_11 = arith.constant 0 : index
    %9 = vector.load %arg2[%c0_10, %c0_11] : memref<128x384xf32, #tpu.memory_space<vmem>>, vector<128x384xf32>
    %c1 = arith.constant 1 : index
    %c0_12 = arith.constant 0 : index
    %10 = vector.load %arg3[%c1, %c0_12] : memref<2x384xf32, #tpu.memory_space<vmem>>, vector<1x384xf32>
    %c0_13 = arith.constant 0 : index
    %c0_14 = arith.constant 0 : index
    %11 = vector.load %arg6[%c0_13, %c0_14] : memref<1x128xf32, #tpu.memory_space<vmem>>, vector<1x128xf32>
    %c0_i32 = arith.constant 0 : i32
    %12 = arith.index_cast %c0_i32 : i32 to index
    %c0_15 = arith.constant 0 : index
    %13 = vector.load %arg9[%12, %c0_15] : memref<8x384xf32, #tpu.memory_space<vmem>>, vector<1x384xf32>
    %cst_16 = arith.constant dense<0.000000e+00> : vector<1x384xf32>
    %14 = tpu.matmul %11, %9, %cst_16 {dimension_numbers = #tpu.dot_dimension_numbers<[1], [0], [0], [1], [0, 0, 1, 1], [], []>} : vector<1x128xf32>, vector<128x384xf32>, vector<1x384xf32> -> vector<1x384xf32>
    %15 = arith.addf %14, %10 : vector<1x384xf32>
    %16 = vector.extract_strided_slice %13 {offsets = [0, 0], sizes = [1, 128], strides = [1, 1]} : vector<1x384xf32> to vector<1x128xf32>
    %17 = vector.extract_strided_slice %13 {offsets = [0, 128], sizes = [1, 128], strides = [1, 1]} : vector<1x384xf32> to vector<1x128xf32>
    %18 = vector.extract_strided_slice %13 {offsets = [0, 256], sizes = [1, 128], strides = [1, 1]} : vector<1x384xf32> to vector<1x128xf32>
    %19 = vector.extract_strided_slice %15 {offsets = [0, 0], sizes = [1, 128], strides = [1, 1]} : vector<1x384xf32> to vector<1x128xf32>
    %20 = vector.extract_strided_slice %15 {offsets = [0, 128], sizes = [1, 128], strides = [1, 1]} : vector<1x384xf32> to vector<1x128xf32>
    %21 = vector.extract_strided_slice %15 {offsets = [0, 256], sizes = [1, 128], strides = [1, 1]} : vector<1x384xf32> to vector<1x128xf32>
    %22 = arith.addf %16, %19 : vector<1x128xf32>
    %23 = arith.negf %22 : vector<1x128xf32>
    %24 = math.exp %23 : vector<1x128xf32>
    %cst_17 = arith.constant 1.000000e+00 : f32
    %25 = vector.broadcast %cst_17 : f32 to vector<1x128xf32>
    %26 = arith.addf %25, %24 : vector<1x128xf32>
    %27 = arith.divf %25, %26 : vector<1x128xf32>
    %28 = arith.addf %17, %20 : vector<1x128xf32>
    %29 = arith.negf %28 : vector<1x128xf32>
    %30 = math.exp %29 : vector<1x128xf32>
    %cst_18 = arith.constant 1.000000e+00 : f32
    %31 = vector.broadcast %cst_18 : f32 to vector<1x128xf32>
    %32 = arith.addf %31, %30 : vector<1x128xf32>
    %33 = arith.divf %31, %32 : vector<1x128xf32>
    %34 = arith.mulf %27, %21 : vector<1x128xf32>
    %35 = arith.addf %18, %34 : vector<1x128xf32>
    %36 = math.tanh %35 : vector<1x128xf32>
    %cst_19 = arith.constant 1.000000e+00 : f32
    %37 = vector.broadcast %cst_19 : f32 to vector<1x128xf32>
    %38 = arith.subf %37, %33 : vector<1x128xf32>
    %39 = arith.mulf %38, %36 : vector<1x128xf32>
    %40 = arith.mulf %33, %11 : vector<1x128xf32>
    %41 = arith.addf %39, %40 : vector<1x128xf32>
    %42 = arith.index_cast %c0_i32 : i32 to index
    %c0_20 = arith.constant 0 : index
    %43 = vector.load %arg10[%42, %c0_20] : memref<8x128xf32, #tpu.memory_space<vmem>>, vector<1x128xf32>
    tpu.vector_store %arg10[%42, %c0_20], %41 {strides = array<i32>} : memref<8x128xf32, #tpu.memory_space<vmem>>, vector<1x128xf32>,
    %c1_i32 = arith.constant 1 : i32
    %c0_21 = arith.constant 0 : index
    %c0_22 = arith.constant 0 : index
    %44 = vector.load %arg8[%c0_21, %c0_22] : memref<1x128xf32, #tpu.memory_space<vmem>>, vector<1x128xf32>
    tpu.vector_store %arg8[%c0_21, %c0_22], %41 {strides = array<i32>} : memref<1x128xf32, #tpu.memory_space<vmem>>, vector<1x128xf32>,
    %c0_23 = arith.constant 0 : index
    %c0_24 = arith.constant 0 : index
    %45 = vector.load %arg10[%c0_23, %c0_24] : memref<8x128xf32, #tpu.memory_space<vmem>>, vector<8x128xf32>
    %c0_25 = arith.constant 0 : index
    %c0_26 = arith.constant 0 : index
    %46 = vector.load %arg4[%c0_25, %c0_26] : memref<128x128xf32, #tpu.memory_space<vmem>>, vector<128x128xf32>
    %cst_27 = arith.constant dense<0.000000e+00> : vector<8x128xf32>
    %47 = tpu.matmul %45, %46, %cst_27 {dimension_numbers = #tpu.dot_dimension_numbers<[1], [0], [0], [1], [0, 0, 1, 1], [], []>} : vector<8x128xf32>, vector<128x128xf32>, vector<8x128xf32> -> vector<8x128xf32>
    %c0_28 = arith.constant 0 : index
    %c0_29 = arith.constant 0 : index
    %48 = vector.load %arg5[%c0_28, %c0_29] : memref<1x128xf32, #tpu.memory_space<vmem>>, vector<1x128xf32>
    %49 = vector.broadcast %48 : vector<1x128xf32> to vector<8x128xf32>
    %50 = arith.addf %47, %49 : vector<8x128xf32>
    %51 = tpu.iota {dimensions = array<i32: 1>} : vector<1x128xi32>
    %c64_i32 = arith.constant 64 : i32
    %52 = vector.broadcast %c64_i32 : i32 to vector<1x128xi32>
    %53 = arith.cmpi slt, %51, %52 : vector<1x128xi32>
    %cst_30 = arith.constant -1.000000e+30 : f32
    %54 = vector.shape_cast %53 : vector<1x128xi1> to vector<1x128xi1>
    %55 = vector.broadcast %54 : vector<1x128xi1> to vector<8x128xi1>
    %56 = vector.broadcast %cst_30 : f32 to vector<8x128xf32>
    %57 = arith.select %55, %50, %56 : vector<8x128xi1>, vector<8x128xf32>
    %cst_31 = arith.constant dense<0xFF800000> : vector<8xf32>
    %58 = vector.multi_reduction <maximumf>, %57, %cst_31 [1] : vector<8x128xf32> to vector<8xf32>
    %59 = vector.shape_cast %58 : vector<8xf32> to vector<8x1xf32>
    %60 = vector.broadcast %59 : vector<8x1xf32> to vector<8x128xf32>
    %61 = arith.subf %57, %60 : vector<8x128xf32>
    %62 = math.exp %61 : vector<8x128xf32>
    %cst_32 = arith.constant dense<0.000000e+00> : vector<8xf32>
    %63 = vector.multi_reduction <add>, %62, %cst_32 [1] : vector<8x128xf32> to vector<8xf32>
    %64 = vector.shape_cast %63 : vector<8xf32> to vector<8x1xf32>
    %65 = math.log %64 : vector<8x1xf32>
    %66 = vector.broadcast %65 : vector<8x1xf32> to vector<8x128xf32>
    %67 = arith.subf %61, %66 : vector<8x128xf32>
    %c0_33 = arith.constant 0 : index
    %c0_34 = arith.constant 0 : index
    %68 = vector.load %arg7[%c0_33, %c0_34] : memref<8x128xf32, #tpu.memory_space<vmem>>, vector<8x128xf32>
    tpu.vector_store %arg7[%c0_33, %c0_34], %67 {strides = array<i32>} : memref<8x128xf32, #tpu.memory_space<vmem>>, vector<8x128xf32>,
    return
  }
}

</mosaic_0001>

<bundles_post_ra>
// kernel: tpu_custom_call.1
= control target key start
LH: loop header
LB: loop body
LE: loop exit
PB: predicated region body
PF: predicated region fallthrough
CT: control target
= control target key end

     0   :  { %14 = vsyncpa [#allocation5], 0  ;;  %s1083_s0 = inlined_call_operand.hbm [shape: f32[8,16], index: 0, kind: input, shape index: {}]   ;;  %s1084_s1 = inlined_call_operand.hbm [shape: f32[16,384], index: 1, kind: input, shape index: {}]   ;;  %s1085_s2 = inlined_call_operand.hbm [shape: f32[128,384], index: 2, kind: input, shape index: {}]   ;;  %s1086_s3 = inlined_call_operand.hbm [shape: f32[2,384], index: 3, kind: input, shape index: {}]   ;;  %s1087_s4 = inlined_call_operand.hbm [shape: f32[128,128], index: 4, kind: input, shape index: {}]   ;;  %s1088_s5 = inlined_call_operand.vmem [shape: f32[1,128], index: 5, kind: input, shape index: {}]   ;;  %s1089_s6 = inlined_call_operand.vmem [shape: f32[1,128], index: 6, kind: input, shape index: {}]   ;;  %s1090_s7 = inlined_call_operand.hbm [shape: f32[8,128], index: 7, kind: output, shape index: {0}]   ;;  %s1091_s8 = inlined_call_operand.hbm [shape: f32[1,128], index: 8, kind: output, shape index: {1}]  }
   0x1   :  { %15 = vsyncpa [#allocation8], 0 }
   0x2   :  { %16 = vsyncpa [#allocation11], 0 }
   0x3   :  { %17 = vsyncpa [#allocation6], 0 }
   0x4   :  { %18 = vsyncpa [#allocation15], 0  ;;  %s942_s27 = smov [#allocation7]  }
   0x5   :  { %s34_s28 = sshll.u32 %s942_s27, 4  ;;  %s35_s28 = int_to_ptr.vmem [resolvable:$true] %s34_s28 }
   0x6   :  { %s800_s29 = scalar_lea.vmem %s35_s28, 768  ;;  %p805_p1 = scmp.lt.s32.totalorder %s35_s28, %s35_s28 }
   0x7   :  { %p801_p0 = scmp.ne.s32.totalorder %s35_s28, %s800_s29  ;;  %p806_p2 = scmp.lt.s32.totalorder %s800_s29, %s800_s29 }
   0x9   :  { %p807_p3 = por %p806_p2, %p805_p1 }
   0xb   :  { %p808_p4 = pnand %p807_p3, %p801_p0 }
   0xd   :  { %811 = shalt.err (!%p808_p4)
}
   0xe   :  { %s943_s30 = smov 384   ;;  %s944_s9 = smov 24  }
   0xf   :  { %40 = dma.hbm_to_vmem [thread:$0]  %s1084_s1, 768, %s35_s28, [#allocation8], %s943_s30, %s943_s30, %s944_s9  }
  0x10   :  { %s945_s12 = smov [#allocation10]   ;;  %s946_s14 = smov [#allocation4]  }
  0x11   :  { %s59_s13 = sshll.u32 %s945_s12, 4  ;;  %s25_s15 = sshll.u32 %s946_s14, 4  ;;  %s60_s13 = int_to_ptr.vmem [resolvable:$true] %s59_s13  ;;  %s26_s15 = int_to_ptr.vmem [resolvable:$true] %s25_s15 }
  0x12   :  { %s820_s16 = scalar_lea.vmem %s60_s13, 96  ;;  %p825_p6 = scmp.lt.s32.totalorder %s60_s13, %s60_s13 }
  0x13   :  { %p821_p5 = scmp.ne.s32.totalorder %s60_s13, %s820_s16  ;;  %p826_p7 = scmp.lt.s32.totalorder %s820_s16, %s820_s16 }
  0x15   :  { %p827_p8 = por %p826_p7, %p825_p6 }
  0x17   :  { %p828_p9 = pnand %p827_p8, %p821_p5 }
  0x19   :  { %831 = shalt.err (!%p828_p9)
}
  0x1a   :  { %62 = dma.hbm_to_vmem [thread:$0]  %s1086_s3, 96, %s60_s13, [#allocation11]  }
  0x1b   :  { %s840_s19 = scalar_lea.vmem %s26_s15, 128  ;;  %p845_p11 = scmp.lt.s32.totalorder %s26_s15, %s26_s15 }
  0x1c   :  { %p841_p10 = scmp.ne.s32.totalorder %s26_s15, %s840_s19  ;;  %p846_p12 = scmp.lt.s32.totalorder %s840_s19, %s840_s19 }
  0x1e   :  { %p847_p13 = por %p846_p12, %p845_p11 }
  0x20   :  { %p848_p0 = pnand %p847_p13, %p841_p10 }
  0x22   :  { %851 = shalt.err (!%p848_p0)
}
  0x23   :  { %28 = dma.hbm_to_vmem [thread:$0]  %s1083_s0, 128, %s26_s15, [#allocation5]  }
  0x24   :  { %s947_s21 = smov [#allocation9]   ;;  %s948_s23 = smov [#allocation12]  }
  0x25   :  { %s46_s22 = sshll.u32 %s947_s21, 4  ;;  %s68_s24 = sshll.u32 %s948_s23, 4  ;;  %s47_s22 = int_to_ptr.vmem [resolvable:$true] %s46_s22  ;;  %s69_s24 = int_to_ptr.vmem [resolvable:$true] %s68_s24 }
  0x26   :  { %s860_s25 = scalar_lea.vmem %s47_s22, 6144  ;;  %p865_p2 = scmp.lt.s32.totalorder %s47_s22, %s47_s22 }
  0x27   :  { %p861_p1 = scmp.ne.s32.totalorder %s47_s22, %s860_s25  ;;  %p866_p3 = scmp.lt.s32.totalorder %s860_s25, %s860_s25 }
  0x29   :  { %p867_p4 = por %p866_p3, %p865_p2 }
  0x2b   :  { %p868_p5 = pnand %p867_p4, %p861_p1 }
  0x2d   :  { %871 = shalt.err (!%p868_p5)
}
  0x2e   :  { %52 = dma.hbm_to_vmem [thread:$0]  %s1085_s2, 6144, %s47_s22, [#allocation8], %s943_s30, %s943_s30, %s944_s9  }
  0x2f   :  { %s880_s0 = scalar_lea.vmem %s69_s24, 2048  ;;  %p885_p7 = scmp.lt.s32.totalorder %s69_s24, %s69_s24 }
  0x30   :  { %p881_p6 = scmp.ne.s32.totalorder %s69_s24, %s880_s0  ;;  %p886_p8 = scmp.lt.s32.totalorder %s880_s0, %s880_s0 }
  0x32   :  { %p887_p9 = por %p886_p8, %p885_p7 }
  0x34   :  { %p888_p10 = pnand %p887_p9, %p881_p6 }
  0x36   :  { %891 = shalt.err (!%p888_p10)
}
  0x37   :  { %s949_s27 = smov 128   ;;  %s950_s28 = smov 8  }
  0x38   :  { %74 = dma.hbm_to_vmem [thread:$0]  %s1087_s4, 2048, %s69_s24, [#allocation11], %s949_s27, %s949_s27, %s950_s28  }
  0x39   :  { %932 = dma.done.wait [#allocation5], 128  }
  0x3a   :  { %933 = vsyncadd [#allocation5], 4294967168 }
  0x3b   :  { %934 = dma.done.wait [#allocation8], 6912  }
  0x3c   :  { %935 = vsyncadd [#allocation8], 4294960384 }
  0x3d   :  { %936 = dma.done.wait [#allocation11], 2144  }
  0x3e   :  { %937 = vsyncadd [#allocation11], 4294965152  ;;  %v951_v0 = vmov 0.0   ;;  %v313_v1 = vld [vmem:[#allocation9 + $0x170] sm:$0xff]  ;;  %v312_v2 = vld [vmem:[#allocation9 + $0x168] sm:$0xff]  ;;  %vm118_vm0 = vcmask 130048  }
  0x3f   :  { %186 = vmatprep.mubr.f32.mxu1 %v951_v0  ;;  %266 = vst [vmem:[#allocation3] sm:$0xff] %v951_v0  ;;  %399 = vmatprep.mubr.f32.mxu0 %v951_v0  ;;  %v310_v3 = vld [vmem:[#allocation9 + $0x158] sm:$0xff]  ;;  %v309_v4 = vld [vmem:[#allocation9 + $0x150] sm:$0xff]  ;;  %v307_v5 = vld [vmem:[#allocation9 + $0x140] sm:$0xff]  ;;  %vm952_vm1 = vmmov 0   ;;  %s953_s9 = smov [#allocation14]  }
  0x40   :  { %335 = vmatprep.subr.mxu0 %v313_v1  ;;  %v306_v6 = vld [vmem:[#allocation9 + $0x138] sm:$0xff]  ;;  %v304_v7 = vld [vmem:[#allocation9 + $0x128] sm:$0xff]  ;;  %v99_v8 = vld [vmem:[#allocation7 + $0x20] sm:$0xff]  ;;  %s631_s11 = sshll.u32 %s953_s9, 4  ;;  %s632_s11 = int_to_ptr.vmem [resolvable:$true] %s631_s11 }
  0x41   :  { %336 = vmatpush1.msra.mxu0 %v312_v2  ;;  %v98_v9 = vld [vmem:[#allocation7 + $0x18] sm:$0xff]  ;;  %v303_v10 = vld [vmem:[#allocation9 + $0x120] sm:$0xff]  ;;  %150 = vmatprep.subr.mxu1 %v99_v8  ;;  %v96_v11 = vld [vmem:[#allocation7 + $0x8] sm:$0xff]  ;;  %s892_s12 = scalar_lea.vmem %s632_s11, 16  ;;  %s896_s13 = scalar_lea.vmem %s632_s11, 32 }
  0x42   :  { %337 = vmatprep.subr.mxu0 %v310_v3  ;;  %v301_v12 = vld [vmem:[#allocation9 + $0x110] sm:$0xff]  ;;  %151 = vmatpush1.msra.mxu1 %v98_v9  ;;  %v94_v14 = vld [vmem:[#allocation4] sm:$0xff]  ;;  %v298_v16 = vld [vmem:[#allocation9 + $0xf8] sm:$0xff]  ;;  %p893_p11 = scmp.ne.s32.totalorder %s632_s11, %s892_s12  ;;  %p897_p12 = scmp.lt.s32.totalorder %s632_s11, %s632_s11 }
  0x43   :  { %338 = vmatpush1.msra.mxu0 %v309_v4  ;;  %v95_v13 = vld [vmem:[#allocation7] sm:$0xff]  ;;  %v300_v15 = vld [vmem:[#allocation9 + $0x108] sm:$0xff]  ;;  %152 = vmatprep.subr.mxu1 %v96_v11  ;;  %v100_v17 = vld [vmem:[#allocation7 + $0x28] sm:$0xff]  ;;  %p898_p13 = scmp.lt.s32.totalorder %s896_s13, %s892_s12 }
  0x44   :  { %339 = vmatprep.subr.mxu0 %v307_v5  ;;  %153 = vmatpush1.msra.mxu1 %v95_v13  ;;  %v297_v18 = vld [vmem:[#allocation9 + $0xf0] sm:$0xff]  ;;  %v295_v19 = vld [vmem:[#allocation9 + $0xe0] sm:$0xff]  ;;  %v294_v21 = vld [vmem:[#allocation9 + $0xd8] sm:$0xff] }
  0x45   :  { %340 = vmatpush1.msra.mxu0 %v306_v6  ;;  %646 = vmatmul.mubr.msk.f32.vlgmr.msra.gmra.mxu1 %vm118_vm0, %v94_v14  ;;  %v97_v20 = vld [vmem:[#allocation7 + $0x10] sm:$0xff]  ;;  %v292_v22 = vld [vmem:[#allocation9 + $0xc8] sm:$0xff]  ;;  %v289_v24 = vld [vmem:[#allocation9 + $0xb0] sm:$0xff]  ;;  %p899_p0 = por %p898_p13, %p897_p12 }
  0x46   :  { %341 = vmatprep.subr.mxu0 %v304_v7  ;;  %688 = vmatprep.subr.mxu1 %v951_v0  ;;  %v291_v23 = vld [vmem:[#allocation9 + $0xc0] sm:$0xff]  ;;  %v314_v25 = vld [vmem:[#allocation9 + $0x178] sm:$0xff]  ;;  %v288_v26 = vld [vmem:[#allocation9 + $0xa8] sm:$0xff] }
  0x47   :  { %342 = vmatpush1.msra.mxu0 %v303_v10  ;;  %689 = vmatpush3.msra.mxu1 %v100_v17  ;;  %v286_v27 = vld [vmem:[#allocation9 + $0x98] sm:$0xff]  ;;  %v311_v28 = vld [vmem:[#allocation9 + $0x160] sm:$0xff]  ;;  %v285_v29 = vld [vmem:[#allocation9 + $0x90] sm:$0xff]  ;;  %v103_v10 = vlaneseq  ;;  %p900_p1 = pnand %p899_p0, %p893_p11 }
  0x48   :  { %343 = vmatprep.subr.mxu0 %v301_v12  ;;  %690 = vmatprep.subr.mxu1 %v951_v0  ;;  %v283_v30 = vld [vmem:[#allocation9 + $0x80] sm:$0xff]  ;;  %v308_v31 = vld [vmem:[#allocation9 + $0x148] sm:$0xff]  ;;  %v282_v32 = vld [vmem:[#allocation9 + $0x78] sm:$0xff] }
  0x49   :  { %344 = vmatpush1.msra.mxu0 %v300_v15  ;;  %691 = vmatpush3.msra.mxu1 %v97_v20  ;;  %v280_v33 = vld [vmem:[#allocation9 + $0x68] sm:$0xff]  ;;  %v305_v34 = vld [vmem:[#allocation9 + $0x130] sm:$0xff]  ;;  %v279_v35 = vld [vmem:[#allocation9 + $0x60] sm:$0xff]  ;;  %v104_v11 = vshrl.u32 %v103_v10, 7 }
  0x4a   :  { %345 = vmatprep.subr.mxu0 %v298_v16  ;;  %692 = vmatprep.mubr.msk.f32.mxu1 %vm952_vm1, %v951_v0  ;;  %v277_v36 = vld [vmem:[#allocation9 + $0x50] sm:$0xff]  ;;  %v302_v37 = vld [vmem:[#allocation9 + $0x118] sm:$0xff]  ;;  %v276_v38 = vld [vmem:[#allocation9 + $0x48] sm:$0xff] }
  0x4b   :  { %346 = vmatpush1.msra.mxu0 %v297_v18  ;;  %693 = vmatmul.mubr.msk.f32.vlgmr.msra.gmra.mxu1 %vm118_vm0, %v94_v14  ;;  %v274_v39 = vld [vmem:[#allocation9 + $0x38] sm:$0xff]  ;;  %v299_v40 = vld [vmem:[#allocation9 + $0x100] sm:$0xff]  ;;  %v273_v41 = vld [vmem:[#allocation9 + $0x30] sm:$0xff]  ;;  %v105_v12 = vsub.s32 0, %v104_v11  ;;  %v109_v14 = vsub.s32 1, %v104_v11  ;;  %v113_v17 = vsub.s32 2, %v104_v11 }
  0x4c   :  { %347 = vmatprep.subr.mxu0 %v295_v19  ;;  %695 = vmatprep.subr.mxu1 %v951_v0  ;;  %v271_v42 = vld [vmem:[#allocation9 + $0x20] sm:$0xff]  ;;  %v296_v43 = vld [vmem:[#allocation9 + $0xe8] sm:$0xff]  ;;  %v270_v44 = vld [vmem:[#allocation9 + $0x18] sm:$0xff] }
  0x4d   :  { %348 = vmatpush1.msra.mxu0 %v294_v21  ;;  %696 = vmatpush3.msra.mxu1 %v314_v25  ;;  %v268_v45 = vld [vmem:[#allocation9 + $0x8] sm:$0xff]  ;;  %v293_v46 = vld [vmem:[#allocation9 + $0xd0] sm:$0xff]  ;;  %v267_v47 = vld [vmem:[#allocation9] sm:$0xff] }
  0x4e   :  { %349 = vmatprep.subr.mxu0 %v292_v22  ;;  %697 = vmatprep.subr.mxu1 %v951_v0  ;;  %v1040_v48 = vld [vmem:[%s1089_s6] sm:$0x1]  ;;  %v290_v49 = vld [vmem:[#allocation9 + $0xb8] sm:$0xff]  ;;  %v287_v50 = vld [vmem:[#allocation9 + $0xa0] sm:$0xff] }
  0x4f   :  { %350 = vmatpush1.msra.mxu0 %v291_v23  ;;  %698 = vmatpush3.msra.mxu1 %v311_v28  ;;  %v284_v51 = vld [vmem:[#allocation9 + $0x88] sm:$0xff]  ;;  %v281_v52 = vld [vmem:[#allocation9 + $0x70] sm:$0xff]  ;;  %v278_v53 = vld [vmem:[#allocation9 + $0x58] sm:$0xff] }
  0x50   :  { %351 = vmatprep.subr.mxu0 %v289_v24  ;;  %699 = vmatprep.subr.mxu1 %v951_v0  ;;  %v275_v54 = vld [vmem:[#allocation9 + $0x40] sm:$0xff]  ;;  %v272_v55 = vld [vmem:[#allocation9 + $0x28] sm:$0xff]  ;;  %v269_v56 = vld [vmem:[#allocation9 + $0x10] sm:$0xff] }
  0x51   :  { %352 = vmatpush1.msra.mxu0 %v288_v26  ;;  %700 = vmatpush3.msra.mxu1 %v308_v31  ;;  %v520_v57 = vld [vmem:[#allocation12 + $0x78] sm:$0xff]  ;;  %v519_v58 = vld [vmem:[#allocation12 + $0x70] sm:$0xff]  ;;  %v518_v59 = vld [vmem:[#allocation12 + $0x68] sm:$0xff] }
  0x52   :  { %353 = vmatprep.subr.mxu0 %v286_v27  ;;  %701 = vmatprep.subr.mxu1 %v951_v0  ;;  %v517_v60 = vld [vmem:[#allocation12 + $0x60] sm:$0xff]  ;;  %v516_v61 = vld [vmem:[#allocation12 + $0x58] sm:$0xff]  ;;  %v515_v62 = vld [vmem:[#allocation12 + $0x50] sm:$0xff] }
  0x53   :  { %354 = vmatpush1.msra.mxu0 %v285_v29  ;;  %702 = vmatpush3.msra.mxu1 %v305_v34  ;;  %v514_v63 = vld [vmem:[#allocation12 + $0x48] sm:$0xff]  ;;  %v513_v1 = vld [vmem:[#allocation12 + $0x40] sm:$0xff]  ;;  %v512_v2 = vld [vmem:[#allocation12 + $0x38] sm:$0xff] }
  0x54   :  { %355 = vmatprep.subr.mxu0 %v283_v30  ;;  %703 = vmatprep.subr.mxu1 %v951_v0  ;;  %v511_v3 = vld [vmem:[#allocation12 + $0x30] sm:$0xff]  ;;  %v510_v4 = vld [vmem:[#allocation12 + $0x28] sm:$0xff]  ;;  %v509_v5 = vld [vmem:[#allocation12 + $0x20] sm:$0xff] }
  0x55   :  { %356 = vmatpush1.msra.mxu0 %v282_v32  ;;  %704 = vmatpush3.msra.mxu1 %v302_v37  ;;  %v508_v6 = vld [vmem:[#allocation12 + $0x18] sm:$0xff]  ;;  %v507_v7 = vld [vmem:[#allocation12 + $0x10] sm:$0xff]  ;;  %v506_v8 = vld [vmem:[#allocation12 + $0x8] sm:$0xff] }
  0x56   :  { %357 = vmatprep.subr.mxu0 %v280_v33  ;;  %705 = vmatprep.subr.mxu1 %v951_v0  ;;  %v505_v9 = vld [vmem:[#allocation12] sm:$0xff]  ;;  %v101_v13 = vld [vmem:[#allocation10] ss:$2 sm:$0x7] }
  0x57   :  { %358 = vmatpush1.msra.mxu0 %v279_v35  ;;  %706 = vmatpush3.msra.mxu1 %v299_v40  ;;  %v106_v15 = vrot.slane %v101_v13, %v105_v12  ;;  %v110_v16 = vrot.slane %v101_v13, %v109_v14  ;;  %v114_v22 = vrot.slane %v101_v13, %v113_v17 }
  0x58   :  { %359 = vmatprep.subr.mxu0 %v277_v36  ;;  %707 = vmatprep.subr.mxu1 %v951_v0 }
  0x59   :  { %360 = vmatpush1.msra.mxu0 %v276_v38  ;;  %708 = vmatpush3.msra.mxu1 %v296_v43 }
  0x5a   :  { %361 = vmatprep.subr.mxu0 %v274_v39  ;;  %709 = vmatprep.subr.mxu1 %v951_v0 }
  0x5b   :  { %362 = vmatpush1.msra.mxu0 %v273_v41  ;;  %710 = vmatpush3.msra.mxu1 %v293_v46 }
  0x5c   :  { %363 = vmatprep.subr.mxu0 %v271_v42  ;;  %711 = vmatprep.subr.mxu1 %v951_v0 }
  0x5d   :  { %364 = vmatpush1.msra.mxu0 %v270_v44  ;;  %712 = vmatpush3.msra.mxu1 %v290_v49 }
  0x5e   :  { %365 = vmatprep.subr.mxu0 %v268_v45  ;;  %713 = vmatprep.subr.mxu1 %v951_v0 }
  0x5f   :  { %366 = vmatpush1.msra.mxu0 %v267_v47  ;;  %727 = vmatprep.mubr.msk.f32.mxu1 %vm952_vm1, %v951_v0 }
  0x60   :  { %400 = vmatmul.mubr.f32.vlgmr.msra.gmra.mxu0 %v1040_v48  ;;  %714 = vmatpush3.msra.mxu1 %v287_v50 }
  0x61   :  { %730 = vmatprep.subr.mxu0 %v951_v0  ;;  %715 = vmatprep.subr.mxu1 %v951_v0 }
  0x62   :  { %762 = vmatprep.mubr.msk.f32.mxu0 %vm952_vm1, %v951_v0  ;;  %716 = vmatpush3.msra.mxu1 %v284_v51 }
  0x63   :  { %717 = vmatprep.subr.mxu1 %v951_v0  ;;  %731 = vmatpush3.msra.mxu0 %v520_v57 }
  0x64   :  { %718 = vmatpush3.msra.mxu1 %v281_v52  ;;  %732 = vmatprep.subr.mxu0 %v951_v0 }
  0x65   :  { %719 = vmatprep.subr.mxu1 %v951_v0  ;;  %733 = vmatpush3.msra.mxu0 %v519_v58  ;;  %v599_v58 = vand.u32 127, %v103_v10 }
  0x66   :  { %720 = vmatpush3.msra.mxu1 %v278_v53  ;;  %734 = vmatprep.subr.mxu0 %v951_v0 }
  0x67   :  { %721 = vmatprep.subr.mxu1 %v951_v0  ;;  %735 = vmatpush3.msra.mxu0 %v518_v59  ;;  %v650_v59 = vld [vmem:[%s1088_s5] ss:$0 sm:$0xff]  ;;  %vm600_vm2 = vcmp.lt.s32.totalorder %v599_v58, 64 }
  0x68   :  { %722 = vmatpush3.msra.mxu1 %v275_v54  ;;  %736 = vmatprep.subr.mxu0 %v951_v0 }
  0x69   :  { %723 = vmatprep.subr.mxu1 %v951_v0  ;;  %737 = vmatpush3.msra.mxu0 %v517_v60 }
  0x6a   :  { %724 = vmatpush3.msra.mxu1 %v272_v55  ;;  %738 = vmatprep.subr.mxu0 %v951_v0 }
  0x6b   :  { %725 = vmatprep.subr.mxu1 %v951_v0  ;;  %739 = vmatpush3.msra.mxu0 %v516_v61 }
  0x6c   :  { %726 = vmatpush3.msra.mxu1 %v269_v56  ;;  %740 = vmatprep.subr.mxu0 %v951_v0 }
  0x6d   :  { %728 = vmatmul.mubr.f32.vlgmr.msra.gmra.mxu1 %v1040_v48  ;;  %741 = vmatpush3.msra.mxu0 %v515_v62 }
  0x6e   :  { %742 = vmatprep.subr.mxu0 %v951_v0 }
  0x6f   :  { %743 = vmatpush3.msra.mxu0 %v514_v63 }
  0x70   :  { %744 = vmatprep.subr.mxu0 %v951_v0 }
  0x71   :  { %745 = vmatpush3.msra.mxu0 %v513_v1 }
  0x72   :  { %746 = vmatprep.subr.mxu0 %v951_v0 }
  0x73   :  { %747 = vmatpush3.msra.mxu0 %v512_v2 }
  0x74   :  { %748 = vmatprep.subr.mxu0 %v951_v0 }
  0x75   :  { %749 = vmatpush3.msra.mxu0 %v511_v3 }
  0x76   :  { %750 = vmatprep.subr.mxu0 %v951_v0 }
  0x77   :  { %751 = vmatpush3.msra.mxu0 %v510_v4 }
  0x78   :  { %752 = vmatprep.subr.mxu0 %v951_v0 }
  0x79   :  { %753 = vmatpush3.msra.mxu0 %v509_v5 }
  0x7a   :  { %754 = vmatprep.subr.mxu0 %v951_v0 }
  0x7b   :  { %755 = vmatpush3.msra.mxu0 %v508_v6 }
  0x7c   :  { %756 = vmatprep.subr.mxu0 %v951_v0 }
  0x7d   :  { %757 = vmatpush3.msra.mxu0 %v507_v7 }
  0x7e   :  { %758 = vmatprep.subr.mxu0 %v951_v0 }
  0x7f   :  { %759 = vmatpush3.msra.mxu0 %v506_v8 }
  0x80   :  { %760 = vmatprep.subr.mxu0 %v951_v0  ;;  %v316_v0 = vld [vmem:[#allocation10 + $0x1] ss:$2 sm:$0x7] }
  0x81   :  { %761 = vmatpush3.msra.mxu0 %v505_v9  ;;  %v323_v26 = vrot.slane %v316_v0, %v105_v12  ;;  %v327_v29 = vrot.slane %v316_v0, %v109_v14  ;;  %v331_v42 = vrot.slane %v316_v0, %v113_v17 }
 0x105   :  { %v188_v18 = vpop.f32.mrf.mxu1 }
 0x106   :  { %v189_v19 = vadd.f32 %v188_v18, %v106_v15 }
 0x107   :  { %v190_v20 = vpop.f32.mrf.mxu1 }
 0x108   :  { %263 = vst [vmem:[#allocation2] sm:$0xff] %v189_v19  ;;  %v191_v21 = vadd.f32 %v190_v20, %v110_v16 }
 0x10a   :  { %264 = vst [vmem:[#allocation2 + $0x8] sm:$0xff] %v191_v21 }
 0x10b   :  { %v259_v23 = vpop.f32.mrf.mxu1 }
 0x10c   :  { %v260_v24 = vadd.f32 %v259_v23, %v114_v22 }
 0x10d   :  { %v694_v25 = vpop.f32.mrf.mxu1 }
 0x10e   :  { %265 = vst [vmem:[#allocation2 + $0x10] sm:$0xff] %v260_v24 }
 0x115   :  { %v318_v30 = vld [vmem:[#allocation2] ss:$8 sm:$0x7] }
 0x116   :  { %v484_v35 = vrot.slane %v318_v30, 1  ;;  %v494_v49 = vrot.slane %v318_v30, 2 }
 0x120   :  { %v401_v27 = vpop.f32.mrf.mxu0 }
 0x121   :  { %v402_v28 = vadd.f32 %v401_v27, %v323_v26 }
 0x122   :  { %v403_v31 = vpop.f32.mrf.mxu0 }
 0x123   :  { %v476_v32 = vadd.f32 %v402_v28, %v318_v30  ;;  %v404_v34 = vadd.f32 %v403_v31, %v327_v29 }
 0x125   :  { %v648_v33 = vmul.f32 -1.442695, %v476_v32  ;;  %v486_v36 = vadd.f32 %v484_v35, %v404_v34 }
 0x127   :  { %778 = vpow2.f32 %v648_v33  ;;  %v649_v37 = vmul.f32 -1.442695, %v486_v36 }
 0x129   :  { %780 = vpow2.f32 %v649_v37 }
 0x12d   :  { %v472_v38 = vpop.f32.mrf.mxu1 }
 0x12e   :  { %v473_v45 = vadd.f32 %v472_v38, %v331_v42 }
 0x12f   :  { %v729_v39 = vpop.f32.mrf.mxu1 }
 0x134   :  { %v779_v40 = vpop.eup %778 }
 0x135   :  { %v480_v41 = vadd.f32 1.0, %v779_v40 }
 0x136   :  { %v781_v43 = vpop.eup %780 }
 0x137   :  { %782 = vrcp.f32 %v480_v41  ;;  %v490_v44 = vadd.f32 1.0, %v781_v43 }
 0x139   :  { %784 = vrcp.f32 %v490_v44 }
 0x144   :  { %v783_v46 = vpop.eup %782 }
 0x145   :  { %v493_v47 = vmul.f32 %v783_v46, %v473_v45 }
 0x146   :  { %v785_v51 = vpop.eup %784 }
 0x147   :  { %v496_v50 = vadd.f32 %v494_v49, %v493_v47  ;;  %v498_v52 = vsub.f32 1.0, %v785_v51  ;;  %v500_v54 = vmul.f32 %v785_v51, %v1040_v48 }
 0x149   :  { %786 = vtanh.f32 %v496_v50 }
 0x156   :  { %v787_v53 = vpop.eup %786 }
 0x157   :  { %v499_v55 = vmul.f32 %v787_v53, %v498_v52 }
 0x159   :  { %v501_v56 = vadd.f32 %v500_v54, %v499_v55 }
 0x15b   :  { %502 = vst [vmem:[#allocation3] sm:$0x1] %v501_v56  ;;  %503 = vst [vmem:[#allocation14] sm:$0x1] %v501_v56 }
 0x162   :  { %v504_v57 = vld [vmem:[#allocation3] sm:$0xff] }
 0x163   :  { %763 = vmatmul.mubr.f32.vlgmr.msra.gmra.mxu0 %v504_v57 }
 0x223   :  { %v594_v60 = vpop.f32.mrf.mxu0 }
 0x224   :  { %v595_v61 = vadd.f32 %v650_v59, %v594_v60 }
 0x225   :  { %v764_v62 = vpop.f32.mrf.mxu0 }
 0x226   :  { %v603_v63 = vsel %vm600_vm2, %v595_v61, -1e+30 }
 0x227   :  { %604 = vmax.xlane.f32.xlu0 %v603_v63 }
 0x2b0   :  { %v605_v1 = vpop.xlane.xlu0 %604 }
 0x2b1   :  { %v606_v2 = vsub.f32 %v603_v63, %v605_v1 }
 0x2b3   :  { %v607_v48 = vmul.f32 1.442695, %v606_v2 }
 0x2b5   :  { %788 = vpow2.f32 %v607_v48 }
 0x2c2   :  { %v789_v3 = vpop.eup %788 }
 0x2c3   :  { %609 = vadd.xlane.f32.xlu0 %v789_v3 }
 0x2c4   :  { %903 = shalt.err (!%p900_p1)
}
 0x2c5   :  { %634 = dma.vmem_to_hbm [thread:$0]  %s632_s11, 16, %s1091_s8, [#allocation15]  }
 0x2c6   :  { %s954_s15 = smov [#allocation13]  }
 0x2c7   :  { %s621_s16 = sshll.u32 %s954_s15, 4  ;;  %s622_s16 = int_to_ptr.vmem [resolvable:$true] %s621_s16 }
 0x2c8   :  { %s912_s17 = scalar_lea.vmem %s622_s16, 128  ;;  %p917_p3 = scmp.lt.s32.totalorder %s622_s16, %s622_s16 }
 0x2c9   :  { %p913_p2 = scmp.ne.s32.totalorder %s622_s16, %s912_s17  ;;  %p918_p4 = scmp.lt.s32.totalorder %s912_s17, %s912_s17 }
 0x2cb   :  { %p919_p5 = por %p918_p4, %p917_p3 }
 0x2cd   :  { %p920_p6 = pnand %p919_p5, %p913_p2 }
 0x34c   :  { %v610_v4 = vpop.xlane.xlu0 %609 }
 0x34d   :  { %790 = vlog2.f32 %v610_v4 }
 0x35a   :  { %v791_v5 = vpop.eup %790 }
 0x35b   :  { %v612_v6 = vmul.f32 0.6931472, %v791_v5 }
 0x35d   :  { %v613_v7 = vsub.f32 %v606_v2, %v612_v6 }
 0x35f   :  { %614 = vst [vmem:[#allocation13] sm:$0xff] %v613_v7 }
 0x360   :  { %923 = shalt.err (!%p920_p6)
}
 0x361   :  { %624 = dma.vmem_to_hbm [thread:$0]  %s622_s16, 128, %s1090_s7, [#allocation6]  }
 0x362   :  { %938 = dma.done.wait [#allocation6], 128  }
 0x363   :  { %939 = vsyncadd [#allocation6], 4294967168 }
 0x364   :  { %940 = dma.done.wait [#allocation15], 16  }
 0x365   :  { %941 = vsyncadd [#allocation15], 4294967280 }
 0x366   :  { %641 = vsyncpa [#allocation5], 1 }
 0x367   :  { %642 = vsyncpa [#allocation8], 1 }
 0x368   :  { %643 = vsyncpa [#allocation11], 1 }
 0x369   :  { %644 = vsyncpa [#allocation6], 1 }
 0x36a   :  { %645 = vsyncpa [#allocation15], 1 }

</bundles_post_ra>
